<compile_context>
chip_gen: v7x
topology: tpu7x:2x2x1
jax: 0.10.0
libtpu: 0.0.40
codegen_flags: <defaults>
</compile_context>

<pallas_src>
import functools

import jax
import jax.numpy as jnp
from jax import lax
from jax.experimental import pallas as pl
from jax.experimental.pallas import tpu as pltpu


_TAPS_3X3 = tuple((dh, dw) for dh in (-1, 0, 1) for dw in (-1, 0, 1))


# ----------------------------------------------------------------------------
# Fused UpBlockUnet kernel (one batch element per grid step)
# ----------------------------------------------------------------------------
def _upblock_kernel(
    x_ref, down_ref, temb_ref,
    up_tw_ref, up_g_ref, up_b_ref,
    a_in_ref, gn1_g_ref, gn1_b_ref,
    c1_tw_ref, c1_b_ref,
    temb_w_ref, temb_b_ref,
    a_out_ref, gn2_g_ref, gn2_b_ref,
    c2_tw_ref, c2_b_ref,
    res_w_ref, res_b_ref,
    mask_ref, qkv_w_ref, qkv_b_ref,
    a_attn_ref, agn_g_ref, agn_b_ref,
    o_ref,
    *, shifts, eps):
  f32 = jnp.float32
  S = o_ref.shape[-1]                      # spatial size (lane axis)

  def groupnorm(v, a_ref, g_ref, b_ref, *, silu):
    # v: (C, S). a_ref: (C, C) group-averaging matrix (contains the 1/n factor).
    # Two-pass variance (subtract mean first) for numerical robustness.
    mean = jnp.sum(jnp.dot(a_ref[...], v, preferred_element_type=f32),
                   axis=1, keepdims=True)                       # (C, 1)
    vc = v - mean
    var = jnp.sum(jnp.dot(a_ref[...], vc * vc, preferred_element_type=f32),
                  axis=1, keepdims=True)                        # (C, 1)
    y = vc * lax.rsqrt(var + eps) * g_ref[...] + b_ref[...]
    if silu:
      y = y * jax.nn.sigmoid(y)
    return y

  def conv3x3(v, w_ref, b_ref):
    # Implicit GEMM: accumulate 9 shifted-window dots, never materializing im2col.
    cout = w_ref.shape[1]
    acc = jnp.zeros((cout, S), f32)
    for t, sh in enumerate(shifts):
      win = v if sh == 0 else pltpu.roll(v, sh, axis=1)
      win = win * mask_ref[t]                                   # zero-pad borders
      acc = acc + jnp.dot(w_ref[t], win, preferred_element_type=f32)
    return acc + b_ref[...]

  x_t = x_ref[0]            # (C_half, S_in)   -- low-res input, channels on sublanes
  down_t = down_ref[0]      # (C_half, S)      -- skip connection at output res

  # --- ConvTranspose2d(4, stride=2, pad=1): polyphase taps + scatter interleave ---
  up = jnp.zeros((up_tw_ref.shape[1], S), f32)
  for t in range(up_tw_ref.shape[0]):
    ph = jnp.dot(up_tw_ref[t], x_t, preferred_element_type=f32)      # (C_half, S_in)
    up = up + jnp.dot(ph, up_g_ref[t], preferred_element_type=f32)   # (C_half, S)
  up = up + up_b_ref[...]

  # --- channel concat ([up ; down]) done on the sublane axis, in VMEM ---
  cat = jnp.concatenate([up, down_t], axis=0)                        # (C_in, S)

  # --- resnet_conv_first: GroupNorm -> SiLU -> Conv3x3 ---
  h = conv3x3(groupnorm(cat, a_in_ref, gn1_g_ref, gn1_b_ref, silu=True),
              c1_tw_ref, c1_b_ref)                                   # (C_out, S)

  # --- time embedding: SiLU -> Linear, broadcast over all spatial positions ---
  te = temb_ref[0]                                                   # (T, 1)
  te = te * jax.nn.sigmoid(te)
  h = h + jnp.dot(temb_w_ref[...],
                  jnp.broadcast_to(te, (te.shape[0], S)),
                  preferred_element_type=f32) + temb_b_ref[...]

  # --- resnet_conv_second: GroupNorm -> SiLU -> Conv3x3, fused 1x1 residual ---
  h2 = conv3x3(groupnorm(h, a_out_ref, gn2_g_ref, gn2_b_ref, silu=True),
               c2_tw_ref, c2_b_ref)
  h2 = h2 + jnp.dot(res_w_ref[...], cat, preferred_element_type=f32) + res_b_ref[...]

  # --- linear attention: fused QKV, softmax over the sequence (lane) axis ---
  cout = h2.shape[0]
  qkv = jnp.dot(qkv_w_ref[...], h2, preferred_element_type=f32) + qkv_b_ref[...]

  def softmax_seq(a):
    m = jnp.max(a, axis=1, keepdims=True)
    e = jnp.exp(a - m)
    return e * pl.reciprocal(jnp.sum(e, axis=1, keepdims=True), approx=True)

  q = softmax_seq(qkv[0:cout])
  k = softmax_seq(qkv[cout:2 * cout])
  v = qkv[2 * cout:3 * cout]
  # (K^T V)^T via a lane-contracting dot_general (no explicit transpose).
  kv_t = lax.dot_general(v, k, (((1,), (1,)), ((), ())),
                         preferred_element_type=f32)                 # (C_out, C_out)
  att = h2 + jnp.dot(kv_t, q, preferred_element_type=f32)
  out = groupnorm(att, a_attn_ref, agn_g_ref, agn_b_ref, silu=False)
  o_ref[0] = out.astype(o_ref.dtype)


# ----------------------------------------------------------------------------
# Host-side constant preparation (tiny, one-time)
# ----------------------------------------------------------------------------
def _group_avg(channels, groups, n_spatial):
  cg = channels // groups
  gid = jnp.arange(channels) // cg
  same = (gid[:, None] == gid[None, :]).astype(jnp.float32)
  return same / float(cg * n_spatial)


def _conv_masks(H, W):
  s = jnp.arange(H * W)
  h, w = s // W, s % W
  rows = [((h + dh >= 0) & (h + dh < H) & (w + dw >= 0) & (w + dw < W))
          .astype(jnp.float32) for dh, dw in _TAPS_3X3]
  return jnp.stack(rows)[:, None, :]                 # (9, 1, H*W)


def _upsample_tap_mats(up_w, h_in, w_in, stride=2, pad=1):
  """Per-(kh,kw) weight (Cout,Cin) and 0/1 scatter (S_in,S_out) matrices."""
  _, _, K, _ = up_w.shape
  h_out = (h_in - 1) * stride - 2 * pad + K
  w_out = (w_in - 1) * stride - 2 * pad + K
  ih, iw = jnp.arange(h_in), jnp.arange(w_in)
  tap_w, scat = [], []
  for kh in range(K):
    for kw in range(K):
      tap_w.append(up_w[:, :, kh, kw].T)             # (Cout, Cin)
      oh = ih * stride - pad + kh
      ow = iw * stride - pad + kw
      ok = ((oh >= 0) & (oh < h_out))[:, None] & ((ow >= 0) & (ow < w_out))[None, :]
      tgt = jnp.where(ok, oh[:, None] * w_out + ow[None, :], -1).reshape(-1)
      scat.append((tgt[:, None] == jnp.arange(h_out * w_out)[None, :])
                  .astype(jnp.float32))
  return jnp.stack(tap_w), jnp.stack(scat)


_ROLL_REVERSED = None


def _roll_is_reversed():
  """pltpu.roll is expected to match jnp.roll; probe once so conv window offsets
  stay correct even if the rotate direction differs across toolchain versions."""
  global _ROLL_REVERSED
  if _ROLL_REVERSED is None:
    def k(x_ref, o_ref):
      o_ref[...] = pltpu.roll(x_ref[...], 1, axis=1)
    probe = jnp.tile(jnp.arange(128, dtype=jnp.float32)[None, :], (8, 1))
    y = pl.pallas_call(k, out_shape=jax.ShapeDtypeStruct((8, 128), jnp.float32))(probe)
    _ROLL_REVERSED = bool(y[0, 0] == 1.0)
  return _ROLL_REVERSED


# ----------------------------------------------------------------------------
# UpBlockUnet forward (num_layers=1, up_sample=True, attn=True, t_emb given)
# ----------------------------------------------------------------------------
def up_block_unet_forward(x, out_down, t_emb, p, norm_channels=8):
  B, c_half, h_in, w_in = x.shape
  _, c_down, h_out, w_out = out_down.shape
  s_out = h_out * w_out
  c_in = c_half + c_down
  c_out = p["conv1_w"].shape[0]
  t_dim = t_emb.shape[1]

  col = lambda v: v.reshape(-1, 1)

  up_tw, up_g = _upsample_tap_mats(p["up_w"], h_in, w_in)
  masks = _conv_masks(h_out, w_out)
  c1_tw = jnp.stack([p["conv1_w"][:, :, dh + 1, dw + 1] for dh, dw in _TAPS_3X3])
  c2_tw = jnp.stack([p["conv2_w"][:, :, dh + 1, dw + 1] for dh, dw in _TAPS_3X3])
  a_in = _group_avg(c_in, norm_channels, s_out)
  a_out = _group_avg(c_out, norm_channels, s_out)
  a_attn = _group_avg(c_out, 8, s_out)                     # attention GN has 8 groups
  qkv_w = jnp.concatenate([p["q_w"], p["k_w"], p["v_w"]], axis=0)
  qkv_b = col(jnp.concatenate([p["q_b"], p["k_b"], p["v_b"]]))

  offs = [dh * w_out + dw for dh, dw in _TAPS_3X3]
  if _roll_is_reversed():
    shifts = tuple(o % s_out for o in offs)
  else:
    shifts = tuple((-o) % s_out for o in offs)

  # NCHW -> [C, H*W] needs only reshapes (no transposes).
  batch_inputs = [
      x.reshape(B, c_half, h_in * w_in),
      out_down.reshape(B, c_down, s_out),
      t_emb.reshape(B, t_dim, 1),
  ]
  weight_inputs = [
      up_tw, up_g, col(p["up_b"]),
      a_in, col(p["gn1_gamma"]), col(p["gn1_beta"]),
      c1_tw, col(p["conv1_b"]),
      p["temb_w"], col(p["temb_b"]),
      a_out, col(p["gn2_gamma"]), col(p["gn2_beta"]),
      c2_tw, col(p["conv2_b"]),
      p["res_w"][:, :, 0, 0], col(p["res_b"]),
      masks, qkv_w, qkv_b,
      a_attn, col(p["attn_gn_gamma"]), col(p["attn_gn_beta"]),
  ]

  def batch_spec(a):
    nd = a.ndim
    def imap(b):
      return (b,) + (0,) * (nd - 1)
    return pl.BlockSpec((1,) + a.shape[1:], imap)

  def full_spec(a):
    nd = a.ndim
    def imap(b):
      return (0,) * nd
    return pl.BlockSpec(a.shape, imap)

  in_specs = ([batch_spec(a) for a in batch_inputs]
              + [full_spec(a) for a in weight_inputs])

  kernel = functools.partial(_upblock_kernel, shifts=shifts, eps=1e-5)
  out_t = pl.pallas_call(
      kernel,
      out_shape=jax.ShapeDtypeStruct((B, c_out, s_out), jnp.float32),
      grid=(B,),
      in_specs=in_specs,
      out_specs=pl.BlockSpec((1, c_out, s_out), lambda b: (b, 0, 0)),
      compiler_params=pltpu.CompilerParams(
          dimension_semantics=("parallel",),
          vmem_limit_bytes=32 * 1024 * 1024),
  )(*batch_inputs, *weight_inputs)

  return out_t.reshape(B, c_out, h_out, w_out)           # NCHW, reshape only


# ----------------------------------------------------------------------------
# Pure-JAX reference (for an in-script correctness check)
# ----------------------------------------------------------------------------
def _gn_ref(v, gamma, beta, groups, eps=1e-5):
  shape = v.shape
  B, C = shape[0], shape[1]
  vg = v.reshape(B, groups, -1)
  mean = vg.mean(axis=2, keepdims=True)
  var = jnp.mean((vg - mean) ** 2, axis=2, keepdims=True)
  v = ((vg - mean) * lax.rsqrt(var + eps)).reshape(shape)
  bshape = (1, C) + (1,) * (len(shape) - 2)
  return v * gamma.reshape(bshape) + beta.reshape(bshape)


def _conv_ref(v, w, b, pad):
  out = lax.conv_general_dilated(v, w, (1, 1), [(pad, pad), (pad, pad)],
                                 dimension_numbers=("NCHW", "OIHW", "NCHW"))
  return out + b[None, :, None, None]


def _convT_ref(v, w, b, stride=2, pad=1):
  K = w.shape[2]
  w2 = jnp.flip(w, (2, 3)).transpose(1, 0, 2, 3)
  out = lax.conv_general_dilated(v, w2, (1, 1),
                                 [(K - 1 - pad, K - 1 - pad)] * 2,
                                 lhs_dilation=(stride, stride),
                                 dimension_numbers=("NCHW", "OIHW", "NCHW"))
  return out + b[None, :, None, None]


def _ref_forward(x, out_down, t_emb, p, norm_channels=8):
  silu = lambda u: u * jax.nn.sigmoid(u)
  up = _convT_ref(x, p["up_w"], p["up_b"])
  cat = jnp.concatenate([up, out_down], axis=1)
  h = _conv_ref(silu(_gn_ref(cat, p["gn1_gamma"], p["gn1_beta"], norm_channels)),
                p["conv1_w"], p["conv1_b"], 1)
  te = silu(t_emb) @ p["temb_w"].T + p["temb_b"]
  h = h + te[:, :, None, None]
  h2 = _conv_ref(silu(_gn_ref(h, p["gn2_gamma"], p["gn2_beta"], norm_channels)),
                 p["conv2_w"], p["conv2_b"], 1)
  out = h2 + _conv_ref(cat, p["res_w"], p["res_b"], 0)

  B, C, H, W = out.shape
  xr = out.reshape(B, C, H * W).transpose(0, 2, 1)             # (B, S, C)
  Q = jax.nn.softmax(xr @ p["q_w"].T + p["q_b"], axis=1)
  K = jax.nn.softmax(xr @ p["k_w"].T + p["k_b"], axis=1)
  V = xr @ p["v_w"].T + p["v_b"]
  KV = jnp.einsum("bsc,bsd->bcd", K, V)
  Z = jnp.einsum("bsc,bcd->bsd", Q, KV)
  xr = xr + Z
  xr = _gn_ref(xr.transpose(0, 2, 1), p["attn_gn_gamma"], p["attn_gn_beta"], 8)
  return xr.reshape(B, C, H, W)


# ----------------------------------------------------------------------------
# Deterministic parameter init (shapes from the module's __init__)
# ----------------------------------------------------------------------------
def init_params(key, in_channels=16, out_channels=16, t_emb_dim=32):
  ks = jax.random.split(key, 16)
  w = lambda k, shape: 0.1 * jax.random.normal(k, shape, jnp.float32)
  half = in_channels // 2
  return dict(
      up_w=w(ks[0], (half, half, 4, 4)), up_b=w(ks[1], (half,)),
      gn1_gamma=jnp.ones((in_channels,), jnp.float32),
      gn1_beta=jnp.zeros((in_channels,), jnp.float32),
      conv1_w=w(ks[2], (out_channels, in_channels, 3, 3)),
      conv1_b=w(ks[3], (out_channels,)),
      temb_w=w(ks[4], (out_channels, t_emb_dim)), temb_b=w(ks[5], (out_channels,)),
      gn2_gamma=jnp.ones((out_channels,), jnp.float32),
      gn2_beta=jnp.zeros((out_channels,), jnp.float32),
      conv2_w=w(ks[6], (out_channels, out_channels, 3, 3)),
      conv2_b=w(ks[7], (out_channels,)),
      res_w=w(ks[8], (out_channels, in_channels, 1, 1)),
      res_b=w(ks[9], (out_channels,)),
      q_w=w(ks[10], (out_channels, out_channels)), q_b=w(ks[11], (out_channels,)),
      k_w=w(ks[12], (out_channels, out_channels)), k_b=w(ks[13], (out_channels,)),
      v_w=w(ks[14], (out_channels, out_channels)), v_b=w(ks[15], (out_channels,)),
      attn_gn_gamma=jnp.ones((out_channels,), jnp.float32),
      attn_gn_beta=jnp.zeros((out_channels,), jnp.float32),
  )


if __name__ == "__main__":
  B = 2
  in_channels, out_channels = 16, 16
  t_emb_dim, norm_channels = 32, 8
  H = W = 8  # spatial size before upsample -> 16x16 after

  key = jax.random.PRNGKey(0)
  kx, kd, kt, kp = jax.random.split(key, 4)
  x = jax.random.normal(kx, (B, in_channels // 2, H, W), jnp.float32)
  out_down = jax.random.normal(kd, (B, in_channels // 2, 2 * H, 2 * W), jnp.float32)
  t_emb = jax.random.normal(kt, (B, t_emb_dim), jnp.float32)
  params = init_params(kp, in_channels, out_channels, t_emb_dim)

  out = up_block_unet_forward(x, out_down, t_emb, params, norm_channels)
  out = jax.block_until_ready(out)

  ref = _ref_forward(x, out_down, t_emb, params, norm_channels)
  assert out.shape == (B, out_channels, 2 * H, 2 * W), out.shape
  assert bool(jnp.all(jnp.isfinite(out)))
  assert bool(jnp.allclose(out, ref, atol=1e-2, rtol=1e-2)), \
      float(jnp.max(jnp.abs(out - ref)))
  print("KERNEL_OK")
</pallas_src>

<mosaic_0001>
module attributes {stable_mosaic.version = 11 : i64} {
  func.func @k(%arg0: memref<8x128xf32, #tpu.memory_space<vmem>>, %arg1: memref<8x128xf32, #tpu.memory_space<vmem>>) attributes {dimension_semantics = [], scalar_prefetch = 0 : i64, scratch_operands = 0 : i64, tpu.core_type = #tpu.core_type<tc>} {
    %c0 = arith.constant 0 : index
    %c0_0 = arith.constant 0 : index
    %0 = vector.load %arg0[%c0, %c0_0] : memref<8x128xf32, #tpu.memory_space<vmem>>, vector<8x128xf32>
    %c1_i32 = arith.constant 1 : i32
    %1 = tpu.dynamic_rotate %0 by %c1_i32 dim 1 : vector<8x128xf32>, i32 -> vector<8x128xf32>
    %c0_1 = arith.constant 0 : index
    %c0_2 = arith.constant 0 : index
    %2 = vector.load %arg1[%c0_1, %c0_2] : memref<8x128xf32, #tpu.memory_space<vmem>>, vector<8x128xf32>
    tpu.vector_store %arg1[%c0_1, %c0_2], %1 {strides = array<i32>} : memref<8x128xf32, #tpu.memory_space<vmem>>, vector<8x128xf32>,
    return
  }
}

</mosaic_0001>

<bundles_post_ra>
// kernel: tpu_custom_call.1
= control target key start
LH: loop header
LB: loop body
LE: loop exit
PB: predicated region body
PF: predicated region fallthrough
CT: control target
= control target key end

     0   :  { %6 = vsyncpa [#allocation3], 0  ;;  %s128_s0 = inlined_call_operand.hbm [shape: f32[8,128], index: 0, kind: input, shape index: {}]   ;;  %s129_s1 = inlined_call_operand.hbm [shape: f32[8,128], index: 1, kind: output, shape index: {}]  }
   0x1   :  { %7 = vsyncpa [#allocation4], 0  ;;  %s91_s6 = smov [#allocation2]   ;;  %s43_s10 = scalar_lea.hbm %s128_s0, 128 }
   0x2   :  { %s14_s7 = sshll.u32 %s91_s6, 4  ;;  %p44_p0 = scmp.ne.s32.totalorder %s128_s0, %s43_s10  ;;  %s15_s7 = int_to_ptr.vmem [resolvable:$true] %s14_s7 }
   0x3   :  { %p47_p1 = scmp.lt.u32.totalorder %s43_s10, %s128_s0 }
   0x5   :  { %p49_p2 = pnand %p47_p1, %p44_p0 }
   0x7   :  { %52 = shalt.err (!%p49_p2)
}
   0x8   :  { %s53_s15 = scalar_lea.vmem %s15_s7, 128  ;;  %p58_p4 = scmp.lt.s32.totalorder %s15_s7, %s15_s7 }
   0x9   :  { %p54_p3 = scmp.ne.s32.totalorder %s15_s7, %s53_s15  ;;  %p59_p5 = scmp.lt.s32.totalorder %s53_s15, %s53_s15 }
   0xb   :  { %p60_p6 = por %p59_p5, %p58_p4 }
   0xd   :  { %p61_p7 = pnand %p60_p6, %p54_p3 }
   0xf   :  { %64 = shalt.err (!%p61_p7)
}
  0x10   :  { %17 = dma.hbm_to_vmem [thread:$0]  %s128_s0, 128, %s15_s7, [#allocation3]  }
  0x11   :  { %87 = dma.done.wait [#allocation3], 128  }
  0x12   :  { %88 = vsyncadd [#allocation3], 4294967168  ;;  %v21_v0 = vld [vmem:[#allocation2] sm:$0xff]  ;;  %s92_s18 = smov 1   ;;  %s93_s19 = smov [#allocation5]  }
  0x13   :  { %22 = vrot.lane.b32.xlu0 %v21_v0, %s92_s18  ;;  %s31_s20 = sshll.u32 %s93_s19, 4  ;;  %s32_s20 = int_to_ptr.vmem [resolvable:$true] %s31_s20 }
  0x14   :  { %s65_s21 = scalar_lea.vmem %s32_s20, 128  ;;  %p70_p9 = scmp.lt.s32.totalorder %s32_s20, %s32_s20 }
  0x15   :  { %p66_p8 = scmp.ne.s32.totalorder %s32_s20, %s65_s21  ;;  %p71_p10 = scmp.lt.s32.totalorder %s65_s21, %s65_s21 }
  0x17   :  { %p72_p11 = por %p71_p10, %p70_p9 }
  0x19   :  { %p73_p12 = pnand %p72_p11, %p66_p8 }
  0x85   :  { %v23_v1 = vpop.permute.xlu0 %22 }
  0x86   :  { %24 = vst [vmem:[#allocation5] sm:$0xff] %v23_v1 }
  0x87   :  { %76 = shalt.err (!%p73_p12)
}
  0x88   :  { %s77_s0 = scalar_lea.hbm %s129_s1, 128 }
  0x89   :  { %p78_p13 = scmp.ne.s32.totalorder %s129_s1, %s77_s0  ;;  %p81_p0 = scmp.lt.u32.totalorder %s77_s0, %s129_s1 }
  0x8b   :  { %p83_p1 = pnand %p81_p0, %p78_p13 }
  0x8d   :  { %86 = shalt.err (!%p83_p1)
}
  0x8e   :  { %34 = dma.vmem_to_hbm [thread:$0]  %s32_s20, 128, %s129_s1, [#allocation4]  }
  0x8f   :  { %89 = dma.done.wait [#allocation4], 128  }
  0x90   :  { %90 = vsyncadd [#allocation4], 4294967168 }
  0x91   :  { %38 = vsyncpa [#allocation3], 1 }
  0x92   :  { %39 = vsyncpa [#allocation4], 1 }

</bundles_post_ra>
